<compile_context>
chip_gen: v7x
topology: tpu7x:2x2x1
jax: 0.10.0
libtpu: 0.0.40
codegen_flags: <defaults>
</compile_context>

<pallas_src>
import functools

import jax
import jax.numpy as jnp
from jax.experimental import pallas as pl
from jax.experimental.pallas import tpu as pltpu

_LANES = 128


def _round_up(x, m):
    return ((x + m - 1) // m) * m


def _content_loss_kernel(x_ref, t_ref, part_ref, acc_ref, *,
                         rows, inner_blocks, grid_blocks, mask_start,
                         acc_rows):
    """Per-core partial sum of (x - t)^2 over this core's row blocks."""
    c = pl.program_id(0)          # core-split index
    i = pl.program_id(1)          # block index within this core's range
    row_tile = x_ref.shape[0]
    g = c * inner_blocks + i      # global (possibly over-grid) block index

    @pl.when(i == 0)
    def _():
        acc_ref[...] = jnp.zeros_like(acc_ref)

    d = x_ref[...].astype(jnp.float32) - t_ref[...].astype(jnp.float32)
    dd = d * d

    def accumulate(v):
        # Fold the (row_tile, 128) tile into the small accumulator with pure
        # cross-vreg VALU adds (reshape splits the major dim only).
        acc_ref[...] += v.reshape(-1, acc_rows, _LANES).sum(axis=0)

    if mask_start >= grid_blocks:
        # Every block is fully in-bounds: no masking anywhere (fast path).
        accumulate(dd)
    else:
        # Steady state: unmasked accumulate.
        @pl.when(g < mask_start)
        def _():
            accumulate(dd)

        # Last real (ragged) block and any over-grid block from the core
        # split: zero out rows past the true row count.
        @pl.when(g >= mask_start)
        def _():
            row_idx = jax.lax.broadcasted_iota(jnp.int32,
                                               (row_tile, _LANES), 0)
            global_row = g * row_tile + row_idx
            accumulate(jnp.where(global_row < rows, dd, 0.0))

    @pl.when(i == inner_blocks - 1)
    def _():
        part_ref[0, 0] = jnp.sum(acc_ref[...])


def content_loss_forward(x, target, *, row_tile=4096):
    """Returns (x, mse_loss) matching ContentLoss.forward and .loss."""
    assert x.shape == target.shape, "input/target shape mismatch"
    n_true = x.size

    xf = x.reshape(-1)
    tf = target.reshape(-1)
    rem = n_true % _LANES
    tail_sq = jnp.float32(0.0)
    if rem:
        # <128-element tail is reduced in plain JAX instead of padding both
        # full tensors (avoids doubling HBM traffic on this mem-bound kernel).
        # TODO(synk): fold the tail into the in-kernel mask via a flat element
        # index so XLA never materializes the aligned-prefix slice either.
        xt = xf[n_true - rem:].astype(jnp.float32)
        tt = tf[n_true - rem:].astype(jnp.float32)
        tail_sq = jnp.sum((xt - tt) ** 2)
        xf = xf[: n_true - rem]
        tf = tf[: n_true - rem]

    n_aligned = n_true - rem
    inv_n = jnp.float32(1.0 / float(n_true))
    if n_aligned == 0:
        # Degenerate: fewer than 128 elements total.
        return x, tail_sq * inv_n

    xf = xf.reshape(-1, _LANES)
    tf = tf.reshape(-1, _LANES)
    rows = xf.shape[0]

    # Minimum sublane tile depends on the narrowest dtype (f32:8, bf16:16, i8:32).
    min_item = min(jnp.dtype(x.dtype).itemsize, jnp.dtype(target.dtype).itemsize)
    sub_min = max(8, 32 // max(1, min_item))

    # Clamp the tile to what is needed; keep it accumulator-divisible & legal.
    row_tile = max(sub_min, min(int(row_tile), _round_up(rows, sub_min)))
    if row_tile >= 64:
        row_tile = _round_up(row_tile, max(64, sub_min))
        acc_rows = 64
    else:
        row_tile = _round_up(row_tile, sub_min)
        acc_rows = row_tile

    n_blocks = pl.cdiv(rows, row_tile)
    num_splits = 2 if n_blocks >= 2 else 1      # v7x: one slice per TensorCore
    inner_blocks = pl.cdiv(n_blocks, num_splits)
    grid_blocks = num_splits * inner_blocks
    ragged = (rows % row_tile) != 0
    mask_start = (n_blocks - 1) if ragged else n_blocks

    def in_map(c, i):
        # Over-grid blocks (uneven core split) are clamped onto the last real
        # block; the in-kernel mask zeroes their contribution.
        return (jnp.minimum(c * inner_blocks + i, n_blocks - 1), 0)

    kernel = functools.partial(
        _content_loss_kernel,
        rows=rows, inner_blocks=inner_blocks, grid_blocks=grid_blocks,
        mask_start=mask_start, acc_rows=acc_rows)

    block_bytes = row_tile * _LANES * (jnp.dtype(x.dtype).itemsize +
                                       jnp.dtype(target.dtype).itemsize)
    vmem_need = 2 * block_bytes + acc_rows * _LANES * 4 + (2 << 20)
    # Only raise the scoped-VMEM limit when the requested tiles need it
    # (matters for row_tile > 4096, esp. on v5e's 16 MiB default).
    vmem_limit = int(vmem_need) if vmem_need > (16 << 20) else None

    partials = pl.pallas_call(
        kernel,
        out_shape=jax.ShapeDtypeStruct((num_splits, 1), jnp.float32),
        grid=(num_splits, inner_blocks),
        in_specs=[
            pl.BlockSpec((row_tile, _LANES), in_map),
            pl.BlockSpec((row_tile, _LANES), in_map),
        ],
        out_specs=pl.BlockSpec((1, 1), lambda c, i: (c, 0),
                               memory_space=pltpu.SMEM),
        scratch_shapes=[pltpu.VMEM((acc_rows, _LANES), jnp.float32)],
        compiler_params=pltpu.CompilerParams(
            dimension_semantics=("parallel", "arbitrary"),
            vmem_limit_bytes=vmem_limit),
        cost_estimate=pl.CostEstimate(
            flops=3 * n_aligned, transcendentals=0,
            bytes_accessed=int(xf.nbytes) + int(tf.nbytes) + 8),
    )(xf, tf)

    loss = (jnp.sum(partials) + tail_sq) * inv_n
    # forward() is identity: return the input untouched (no copy).
    return x, loss


if __name__ == "__main__":
    key = jax.random.PRNGKey(0)

    def check(shape, tile, k):
        kx, kt = jax.random.split(k)
        x = jax.random.normal(kx, shape, dtype=jnp.float32)
        # "target" plays the role of the detached activation stored in __init__
        target = jax.random.normal(kt, shape, dtype=jnp.float32)
        out, loss = content_loss_forward(x, target, row_tile=tile)
        out = jax.block_until_ready(out)
        loss = jax.block_until_ready(loss)
        ref = jnp.mean((x - target) ** 2)
        assert jnp.allclose(out, x), "pass-through output mismatch"
        assert jnp.allclose(loss, ref, rtol=1e-5, atol=1e-6), (shape, loss, ref)

    k0, k1, k2 = jax.random.split(key, 3)
    # Primary case: NCHW conv activation, batch=2, channels=4, spatial=16.
    check((2, 4, 16, 16), 4096, k0)
    # Dual core-split path + multi-group accumulator fold (no ragged edge).
    check((4, 8, 32, 32), 128, k1)
    # Ragged rows, over-grid masked block, and <128-element plain-JAX tail.
    check((3, 5, 17, 19), 16, k2)

    print("KERNEL_OK")
</pallas_src>

<mosaic_0001>
module attributes {stable_mosaic.version = 11 : i64} {
  func.func @_content_loss_kernel(%arg0: i32, %arg1: i32, %arg2: memref<16x128xf32, #tpu.memory_space<vmem>>, %arg3: memref<16x128xf32, #tpu.memory_space<vmem>>, %arg4: memref<1x1xf32, #tpu.memory_space<smem>>, %arg5: memref<16x128xf32, #tpu.memory_space<vmem>>) attributes {dimension_semantics = [#tpu.dimension_semantics<parallel>, #tpu.dimension_semantics<arbitrary>], iteration_bounds = array<i64: 1, 1>, scalar_prefetch = 0 : i64, scratch_operands = 1 : i64, tpu.core_type = #tpu.core_type<tc>, window_params = [{transform_indices = @transform_0, window_bounds = array<i64: 16, 128>}, {transform_indices = @transform_1, window_bounds = array<i64: 16, 128>}, {transform_indices = @transform_2, window_bounds = array<i64: 1, 1>}]} {
    %c0_i32 = arith.constant 0 : i32
    %0 = arith.cmpi eq, %arg1, %c0_i32 : i32
    %1 = arith.extui %0 : i1 to i32
    %c0_i32_0 = arith.constant 0 : i32
    %2 = arith.cmpi ne, %1, %c0_i32_0 : i32
    scf.if %2 {
      %cst_10 = arith.constant 0.000000e+00 : f32
      %15 = vector.broadcast %cst_10 : f32 to vector<16x128xf32>
      %c0_11 = arith.constant 0 : index
      %c0_12 = arith.constant 0 : index
      %16 = vector.load %arg5[%c0_11, %c0_12] : memref<16x128xf32, #tpu.memory_space<vmem>>, vector<16x128xf32>
      tpu.vector_store %arg5[%c0_11, %c0_12], %15 {strides = array<i32>} : memref<16x128xf32, #tpu.memory_space<vmem>>, vector<16x128xf32>,
    } else {
    }
    %c0 = arith.constant 0 : index
    %c0_1 = arith.constant 0 : index
    %3 = vector.load %arg2[%c0, %c0_1] : memref<16x128xf32, #tpu.memory_space<vmem>>, vector<16x128xf32>
    %c0_2 = arith.constant 0 : index
    %c0_3 = arith.constant 0 : index
    %4 = vector.load %arg3[%c0_2, %c0_3] : memref<16x128xf32, #tpu.memory_space<vmem>>, vector<16x128xf32>
    %5 = arith.subf %3, %4 : vector<16x128xf32>
    %6 = arith.mulf %5, %5 : vector<16x128xf32>
    %c0_4 = arith.constant 0 : index
    %c0_5 = arith.constant 0 : index
    %7 = vector.load %arg5[%c0_4, %c0_5] : memref<16x128xf32, #tpu.memory_space<vmem>>, vector<16x128xf32>
    %8 = vector.shape_cast %6 : vector<16x128xf32> to vector<1x16x128xf32>
    %cst = arith.constant dense<0.000000e+00> : vector<16x128xf32>
    %9 = vector.multi_reduction <add>, %8, %cst [0] : vector<1x16x128xf32> to vector<16x128xf32>
    %10 = arith.addf %7, %9 : vector<16x128xf32>
    %c0_6 = arith.constant 0 : index
    %c0_7 = arith.constant 0 : index
    %11 = vector.load %arg5[%c0_6, %c0_7] : memref<16x128xf32, #tpu.memory_space<vmem>>, vector<16x128xf32>
    tpu.vector_store %arg5[%c0_6, %c0_7], %10 {strides = array<i32>} : memref<16x128xf32, #tpu.memory_space<vmem>>, vector<16x128xf32>,
    %c0_i32_8 = arith.constant 0 : i32
    %12 = arith.cmpi eq, %arg1, %c0_i32_8 : i32
    %13 = arith.extui %12 : i1 to i32
    %c0_i32_9 = arith.constant 0 : i32
    %14 = arith.cmpi ne, %13, %c0_i32_9 : i32
    scf.if %14 {
      %c0_10 = arith.constant 0 : index
      %c0_11 = arith.constant 0 : index
      %15 = vector.load %arg5[%c0_10, %c0_11] : memref<16x128xf32, #tpu.memory_space<vmem>>, vector<16x128xf32>
      %16 = vector.shape_cast %15 : vector<16x128xf32> to vector<1x16x128xf32>
      %cst_12 = arith.constant dense<0.000000e+00> : vector<1xf32>
      %17 = vector.multi_reduction <add>, %16, %cst_12 [1, 2] : vector<1x16x128xf32> to vector<1xf32>
      %18 = vector.shape_cast %17 : vector<1xf32> to vector<1x1x1xf32>
      %19 = vector.extract %18[0, 0, 0] : f32 from vector<1x1x1xf32>
      %c0_13 = arith.constant 0 : index
      %c0_14 = arith.constant 0 : index
      %20 = memref.load %arg4[%c0_13, %c0_14] : memref<1x1xf32, #tpu.memory_space<smem>>
      memref.store %19, %arg4[%c0_13, %c0_14] : memref<1x1xf32, #tpu.memory_space<smem>>
    } else {
    }
    return
  }
  func.func @transform_0(%arg0: i32, %arg1: i32) -> (i32, i32) {
    %c1_i32 = arith.constant 1 : i32
    %0 = arith.muli %arg0, %c1_i32 : i32
    %1 = arith.addi %0, %arg1 : i32
    %c0_i32 = arith.constant 0 : i32
    %2 = arith.minsi %1, %c0_i32 : i32
    %c0_i32_0 = arith.constant 0 : i32
    %c0_i32_1 = arith.constant 0 : i32
    return %2, %c0_i32_0 : i32, i32
  }
  func.func @transform_1(%arg0: i32, %arg1: i32) -> (i32, i32) {
    %c1_i32 = arith.constant 1 : i32
    %0 = arith.muli %arg0, %c1_i32 : i32
    %1 = arith.addi %0, %arg1 : i32
    %c0_i32 = arith.constant 0 : i32
    %2 = arith.minsi %1, %c0_i32 : i32
    %c0_i32_0 = arith.constant 0 : i32
    %c0_i32_1 = arith.constant 0 : i32
    return %2, %c0_i32_0 : i32, i32
  }
  func.func @transform_2(%arg0: i32, %arg1: i32) -> (i32, i32) {
    %c0_i32 = arith.constant 0 : i32
    %c0_i32_0 = arith.constant 0 : i32
    return %arg0, %c0_i32 : i32, i32
  }
}

</mosaic_0001>

<bundles_post_ra>
// kernel: tpu_custom_call.1
= control target key start
LH: loop header
LB: loop body
LE: loop exit
PB: predicated region body
PF: predicated region fallthrough
CT: control target
= control target key end

     0   :  { %7 = vsyncpa [#allocation4], 0  ;;  %s241_s0 = inlined_call_operand.hbm [shape: f32[16,128], index: 0, kind: input, shape index: {}]   ;;  %s242_s1 = inlined_call_operand.hbm [shape: f32[16,128], index: 1, kind: input, shape index: {}]   ;;  %s243_s2 = inlined_call_operand.hbm [shape: f32[1,1], index: 2, kind: output, shape index: {}]  }
   0x1   :  { %8 = vsyncpa [#allocation7], 0 }
   0x2   :  { %9 = vsyncpa [#allocation5], 0  ;;  %s185_s9 = smov [#allocation3]   ;;  %s125_s13 = scalar_lea.hbm %s241_s0, 256 }
   0x3   :  { %s21_s10 = sshll.u32 %s185_s9, 4  ;;  %p126_p0 = scmp.ne.s32.totalorder %s241_s0, %s125_s13  ;;  %s22_s10 = int_to_ptr.vmem [resolvable:$true] %s21_s10 }
   0x4   :  { %p129_p1 = scmp.lt.u32.totalorder %s125_s13, %s241_s0 }
   0x6   :  { %p131_p2 = pnand %p129_p1, %p126_p0 }
   0x8   :  { %134 = shalt.err (!%p131_p2)
}
   0x9   :  { %s135_s18 = scalar_lea.vmem %s22_s10, 256  ;;  %p140_p4 = scmp.lt.s32.totalorder %s22_s10, %s22_s10 }
   0xa   :  { %p136_p3 = scmp.ne.s32.totalorder %s22_s10, %s135_s18  ;;  %p141_p5 = scmp.lt.s32.totalorder %s135_s18, %s135_s18 }
   0xc   :  { %p142_p6 = por %p141_p5, %p140_p4 }
   0xe   :  { %p143_p7 = pnand %p142_p6, %p136_p3 }
  0x10   :  { %146 = shalt.err (!%p143_p7)
}
  0x11   :  { %s186_s19 = smov 128   ;;  %s187_s20 = smov 8  }
  0x12   :  { %27 = dma.hbm_to_vmem [thread:$0]  %s241_s0, 256, %s22_s10, [#allocation4], %s186_s19, %s186_s19, %s187_s20  }
  0x13   :  { %s188_s23 = smov [#allocation6]   ;;  %s147_s27 = scalar_lea.hbm %s242_s1, 256 }
  0x14   :  { %s39_s24 = sshll.u32 %s188_s23, 4  ;;  %p148_p8 = scmp.ne.s32.totalorder %s242_s1, %s147_s27  ;;  %s40_s24 = int_to_ptr.vmem [resolvable:$true] %s39_s24 }
  0x15   :  { %p151_p9 = scmp.lt.u32.totalorder %s147_s27, %s242_s1 }
  0x17   :  { %p153_p10 = pnand %p151_p9, %p148_p8 }
  0x19   :  { %156 = shalt.err (!%p153_p10)
}
  0x1a   :  { %s157_s4 = scalar_lea.vmem %s40_s24, 256  ;;  %p162_p12 = scmp.lt.s32.totalorder %s40_s24, %s40_s24 }
  0x1b   :  { %p158_p11 = scmp.ne.s32.totalorder %s40_s24, %s157_s4  ;;  %p163_p13 = scmp.lt.s32.totalorder %s157_s4, %s157_s4 }
  0x1d   :  { %p164_p0 = por %p163_p13, %p162_p12 }
  0x1f   :  { %p165_p1 = pnand %p164_p0, %p158_p11 }
  0x21   :  { %168 = shalt.err (!%p165_p1)
}
  0x22   :  { %45 = dma.hbm_to_vmem [thread:$0]  %s242_s1, 256, %s40_s24, [#allocation7], %s186_s19, %s186_s19, %s187_s20  }
  0x23   :  { %179 = dma.done.wait [#allocation4], 256  }
  0x24   :  { %180 = vsyncadd [#allocation4], 4294967040 }
  0x25   :  { %181 = dma.done.wait [#allocation7], 256  }
  0x26   :  { %182 = vsyncadd [#allocation7], 4294967040  ;;  %v66_v0 = vld [vmem:[#allocation3] sm:$0xff]  ;;  %v67_v1 = vld [vmem:[#allocation3 + $0x8] sm:$0xff]  ;;  %s169_s8 = scalar_lea.hbm %s243_s2, 16 }
  0x27   :  { %v68_v2 = vld [vmem:[#allocation6] sm:$0xff]  ;;  %v69_v3 = vld [vmem:[#allocation6 + $0x8] sm:$0xff]  ;;  %p170_p2 = scmp.ne.s32.totalorder %s243_s2, %s169_s8  ;;  %p173_p3 = scmp.lt.u32.totalorder %s169_s8, %s243_s2 }
  0x28   :  { %v70_v4 = vsub.f32 %v66_v0, %v68_v2  ;;  %v71_v5 = vsub.f32 %v67_v1, %v69_v3 }
  0x29   :  { %p175_p4 = pnand %p173_p3, %p170_p2 }
  0x2a   :  { %v72_v6 = vmul.f32 %v70_v4, %v70_v4  ;;  %v73_v7 = vmul.f32 %v71_v5, %v71_v5 }
  0x2c   :  { %v87_v8 = vadd.f32 %v73_v7, %v72_v6 }
  0x2e   :  { %88 = vadd.xlane.f32.xlu0 %v87_v8 }
  0xbb   :  { %v89_v9 = vpop.xlane.xlu0 %88 }
  0xbc   :  { %v90_v10 = vrot.slane %v89_v9, 4 }
  0xbe   :  { %v91_v11 = vadd.f32 %v90_v10, %v89_v9 }
  0xc0   :  { %v92_v12 = vrot.slane %v91_v11, 2 }
  0xc2   :  { %v93_v13 = vadd.f32 %v92_v12, %v91_v11 }
  0xc4   :  { %v94_v14 = vrot.slane %v93_v13, 1 }
  0xc6   :  { %v95_v15 = vadd.f32 %v94_v14, %v93_v13 }
  0xc8   :  { %118 = vpush %v95_v15 }
  0xf9   :  { %s119_s1 = spop %118 }
  0xfa   :  { %98 = sst [smem:[#allocation8]] %s119_s1 }
  0xfb   :  { %178 = shalt.err (!%p175_p4)
}
  0xfc   :  { %s189_s13 = smov [#allocation8]  }
  0xfd   :  { %106 = dma.smem_to_hbm %s189_s13, 16, %s243_s2, [#allocation5]  }
  0xfe   :  { %183 = dma.done.wait [#allocation5], 16  }
  0xff   :  { %184 = vsyncadd [#allocation5], 4294967280 }
 0x100   :  { %110 = sfence }
 0x101   :  { %111 = vsyncpa [#allocation4], 1 }
 0x102   :  { %112 = vsyncpa [#allocation7], 1 }
 0x103   :  { %113 = vsyncpa [#allocation5], 1 }

</bundles_post_ra>
